<compile_context>
chip_gen: v6e
topology: v6e:2x2x1
jax: 0.10.0
libtpu: 0.0.40
codegen_flags: <defaults>
</compile_context>

<pallas_src>
import functools

import jax
import jax.numpy as jnp
from jax.experimental import pallas as pl
from jax.experimental.pallas import tpu as pltpu

HIDDEN = 128
LANE = 128
SUBLANE = 8


def _round_up(x, m):
    return (x + m - 1) // m * m


def dqn_kernel(x_ref, w1_ref, b1_ref, w2_ref, b2_ref, w3_ref, b3_ref, o_ref):
    # x arrives f32 from HBM; cast to bf16 in-register so all three matmuls run
    # on MXU-native bf16 operands with f32 accumulation; bias-add + ReLU
    # epilogue stays in f32.
    x = x_ref[...].astype(jnp.bfloat16)
    h1 = jnp.dot(x, w1_ref[...], preferred_element_type=jnp.float32) + b1_ref[...]
    h1 = jnp.maximum(h1, 0.0)
    h2 = jnp.dot(h1.astype(jnp.bfloat16), w2_ref[...],
                 preferred_element_type=jnp.float32) + b2_ref[...]
    h2 = jnp.maximum(h2, 0.0)
    out = jnp.dot(h2.astype(jnp.bfloat16), w3_ref[...],
                  preferred_element_type=jnp.float32) + b3_ref[...]
    o_ref[...] = out.astype(o_ref.dtype)


def prepare_params(params):
    """One-time weight preparation — call ONCE (or whenever weights change),
    NOT per forward.

    * fc3 output columns zero-padded to a lane-dense multiple of 128 so the
      kernel's output store is an unmasked full-lane vst.
    * Weights cast to bf16 (MXU operands), biases to f32 [1, out] (epilogue).

    Returns (prepared_params, action_size)."""
    w1, b1, w2, b2, w3, b3 = params
    action_size = w3.shape[1]
    out_pad = _round_up(action_size, LANE)
    w3p = jnp.zeros((w3.shape[0], out_pad), jnp.float32).at[:, :action_size].set(w3)
    b3p = jnp.zeros((1, out_pad), jnp.float32).at[:, :action_size].set(
        jnp.reshape(b3, (1, -1)))
    prepared = (
        w1.astype(jnp.bfloat16),
        jnp.reshape(b1, (1, -1)).astype(jnp.float32),
        w2.astype(jnp.bfloat16),
        jnp.reshape(b2, (1, -1)).astype(jnp.float32),
        w3p.astype(jnp.bfloat16),
        b3p.astype(jnp.float32),
    )
    return jax.device_put(prepared), action_size


@functools.partial(jax.jit, static_argnames=("action_size", "tile_b"))
def dqn_forward(x, prepared_params, action_size, *, tile_b=2048):
    """Fused DQN forward. x: [B, state_size] f32 -> [B, action_size] f32.

    `prepared_params` must come from `prepare_params` (padded/casted once)."""
    w1, b1, w2, b2, w3p, b3p = prepared_params
    B, state_size = x.shape
    out_pad = w3p.shape[1]

    # Batch tiling (no wrapper-side padding; Pallas masks the ragged boundary
    # block when B % tb != 0):
    #   * acting-style batches (B <= 256): single block == B (lowest overhead),
    #   * mid-size batches: split into 2 blocks so both v7x TensorCores get
    #     work via the "parallel" grid axis,
    #   * large replay batches: tiles of `tile_b` rows — few, large grid steps
    #     on single-TC v5e/v6e, still >= 2 blocks for v7x.
    if B <= 256:
        tb = B
    elif B <= tile_b:
        tb = _round_up(pl.cdiv(B, 2), SUBLANE)
    else:
        tb = tile_b
    grid = (pl.cdiv(B, tb),)

    flops = 2 * B * (state_size * HIDDEN + HIDDEN * HIDDEN + HIDDEN * out_pad)
    bytes_accessed = (
        B * state_size * 4                           # x (f32, cast in-kernel)
        + B * out_pad * 4                            # out (f32)
        + (state_size * HIDDEN + HIDDEN * HIDDEN + HIDDEN * out_pad) * 2  # weights (bf16)
        + (2 * HIDDEN + out_pad) * 4                 # biases (f32)
    )

    out = pl.pallas_call(
        dqn_kernel,
        out_shape=jax.ShapeDtypeStruct((B, out_pad), jnp.float32),
        grid=grid,
        in_specs=[
            pl.BlockSpec((tb, state_size), lambda i: (i, 0)),      # x tile
            pl.BlockSpec((state_size, HIDDEN), lambda i: (0, 0)),  # w1 (resident)
            pl.BlockSpec((1, HIDDEN), lambda i: (0, 0)),           # b1
            pl.BlockSpec((HIDDEN, HIDDEN), lambda i: (0, 0)),      # w2
            pl.BlockSpec((1, HIDDEN), lambda i: (0, 0)),           # b2
            pl.BlockSpec((HIDDEN, out_pad), lambda i: (0, 0)),     # w3 (padded)
            pl.BlockSpec((1, out_pad), lambda i: (0, 0)),          # b3 (padded)
        ],
        out_specs=pl.BlockSpec((tb, out_pad), lambda i: (i, 0)),
        compiler_params=pltpu.CompilerParams(
            dimension_semantics=("parallel",),       # megacore sharding on v7x
            vmem_limit_bytes=32 * 1024 * 1024,       # ample; footprint is ~3 MiB at tb=2048
        ),
        cost_estimate=pl.CostEstimate(
            flops=flops, transcendentals=0, bytes_accessed=bytes_accessed
        ),
    )(x, w1, b1, w2, b2, w3p, b3p)

    # Strip the lane padding of the final layer.
    # TODO(synk): acting path could argmax over the padded output directly
    # (pad b3 with -inf) and skip this slice entirely.
    return out[:, :action_size]


def init_dqn_params(key, state_size, action_size, hidden=HIDDEN):
    """Deterministic init mimicking PyTorch nn.Linear default U(-1/sqrt(fan_in), +)."""
    keys = jax.random.split(key, 6)

    def linear(kw, kb, fan_in, fan_out):
        bound = 1.0 / jnp.sqrt(fan_in)
        # Stored as [in, out] (PyTorch weight transposed).
        w = jax.random.uniform(kw, (fan_in, fan_out), jnp.float32, -bound, bound)
        b = jax.random.uniform(kb, (1, fan_out), jnp.float32, -bound, bound)
        return w, b

    w1, b1 = linear(keys[0], keys[1], state_size, hidden)
    w2, b2 = linear(keys[2], keys[3], hidden, hidden)
    w3, b3 = linear(keys[4], keys[5], hidden, action_size)
    return (w1, b1, w2, b2, w3, b3)


def dqn_reference(x, params):
    """Pure-JAX f32 reference of the PyTorch forward for validation."""
    w1, b1, w2, b2, w3, b3 = params
    h1 = jnp.maximum(x @ w1 + b1, 0.0)
    h2 = jnp.maximum(h1 @ w2 + b2, 0.0)
    return h2 @ w3 + b3


if __name__ == "__main__":
    state_size = 8
    action_size = 4

    key = jax.random.PRNGKey(0)
    k_x, k_p, k_x2 = jax.random.split(key, 3)
    params = init_dqn_params(k_p, state_size, action_size)

    # One-time weight prep (padding + dtype casts hoisted out of the forward).
    prepared, act_n = prepare_params(params)

    # Small (online-acting style) batch: single block, no grid remainder.
    batch = 2
    x = jax.random.normal(k_x, (batch, state_size), dtype=jnp.float32)
    out = jax.block_until_ready(dqn_forward(x, prepared, act_n))
    ref = dqn_reference(x, params)
    assert out.shape == (batch, action_size)
    # bf16 matmul operands -> loosened tolerance vs f32 reference.
    assert jnp.allclose(out, ref, atol=2e-2, rtol=2e-2), "mismatch vs reference (B=2)"

    # Replay-buffer style batch: exercises the multi-block pipelined grid path
    # (2 blocks of 256 rows -> both TensorCores on v7x).
    batch2 = 512
    x2 = jax.random.normal(k_x2, (batch2, state_size), dtype=jnp.float32)
    out2 = jax.block_until_ready(dqn_forward(x2, prepared, act_n))
    ref2 = dqn_reference(x2, params)
    assert out2.shape == (batch2, action_size)
    assert jnp.allclose(out2, ref2, atol=2e-2, rtol=2e-2), "mismatch vs reference (B=512)"

    print("KERNEL_OK")
</pallas_src>

<mosaic_0001>
module attributes {stable_mosaic.version = 11 : i64} {
  func.func @dqn_kernel(%arg0: i32, %arg1: memref<2x8xf32, #tpu.memory_space<vmem>>, %arg2: memref<8x128xbf16, #tpu.memory_space<vmem>>, %arg3: memref<1x128xf32, #tpu.memory_space<vmem>>, %arg4: memref<128x128xbf16, #tpu.memory_space<vmem>>, %arg5: memref<1x128xf32, #tpu.memory_space<vmem>>, %arg6: memref<128x128xbf16, #tpu.memory_space<vmem>>, %arg7: memref<1x128xf32, #tpu.memory_space<vmem>>, %arg8: memref<2x128xf32, #tpu.memory_space<vmem>>) attributes {dimension_semantics = [#tpu.dimension_semantics<parallel>], iteration_bounds = array<i64: 1>, scalar_prefetch = 0 : i64, scratch_operands = 0 : i64, tpu.core_type = #tpu.core_type<tc>, window_params = [{transform_indices = @transform_0, window_bounds = array<i64: 2, 8>}, {pipeline_mode = #tpu.pipeline_mode<synchronous>, transform_indices = @transform_1, window_bounds = array<i64: 8, 128>}, {pipeline_mode = #tpu.pipeline_mode<synchronous>, transform_indices = @transform_2, window_bounds = array<i64: 1, 128>}, {pipeline_mode = #tpu.pipeline_mode<synchronous>, transform_indices = @transform_3, window_bounds = array<i64: 128, 128>}, {pipeline_mode = #tpu.pipeline_mode<synchronous>, transform_indices = @transform_4, window_bounds = array<i64: 1, 128>}, {pipeline_mode = #tpu.pipeline_mode<synchronous>, transform_indices = @transform_5, window_bounds = array<i64: 128, 128>}, {pipeline_mode = #tpu.pipeline_mode<synchronous>, transform_indices = @transform_6, window_bounds = array<i64: 1, 128>}, {transform_indices = @transform_7, window_bounds = array<i64: 2, 128>}]} {
    %c0 = arith.constant 0 : index
    %c0_0 = arith.constant 0 : index
    %0 = vector.load %arg1[%c0, %c0_0] : memref<2x8xf32, #tpu.memory_space<vmem>>, vector<2x8xf32>
    %1 = arith.truncf %0 : vector<2x8xf32> to vector<2x8xbf16>
    %c0_1 = arith.constant 0 : index
    %c0_2 = arith.constant 0 : index
    %2 = vector.load %arg2[%c0_1, %c0_2] : memref<8x128xbf16, #tpu.memory_space<vmem>>, vector<8x128xbf16>
    %cst = arith.constant dense<0.000000e+00> : vector<2x128xf32>
    %3 = tpu.matmul %1, %2, %cst {dimension_numbers = #tpu.dot_dimension_numbers<[1], [0], [0], [1], [0, 0, 1, 1], [], []>} : vector<2x8xbf16>, vector<8x128xbf16>, vector<2x128xf32> -> vector<2x128xf32>
    %c0_3 = arith.constant 0 : index
    %c0_4 = arith.constant 0 : index
    %4 = vector.load %arg3[%c0_3, %c0_4] : memref<1x128xf32, #tpu.memory_space<vmem>>, vector<1x128xf32>
    %5 = vector.broadcast %4 : vector<1x128xf32> to vector<2x128xf32>
    %6 = arith.addf %3, %5 : vector<2x128xf32>
    %cst_5 = arith.constant 0.000000e+00 : f32
    %7 = vector.broadcast %cst_5 : f32 to vector<2x128xf32>
    %8 = arith.maximumf %6, %7 : vector<2x128xf32>
    %9 = arith.truncf %8 : vector<2x128xf32> to vector<2x128xbf16>
    %c0_6 = arith.constant 0 : index
    %c0_7 = arith.constant 0 : index
    %10 = vector.load %arg4[%c0_6, %c0_7] : memref<128x128xbf16, #tpu.memory_space<vmem>>, vector<128x128xbf16>
    %cst_8 = arith.constant dense<0.000000e+00> : vector<2x128xf32>
    %11 = tpu.matmul %9, %10, %cst_8 {dimension_numbers = #tpu.dot_dimension_numbers<[1], [0], [0], [1], [0, 0, 1, 1], [], []>} : vector<2x128xbf16>, vector<128x128xbf16>, vector<2x128xf32> -> vector<2x128xf32>
    %c0_9 = arith.constant 0 : index
    %c0_10 = arith.constant 0 : index
    %12 = vector.load %arg5[%c0_9, %c0_10] : memref<1x128xf32, #tpu.memory_space<vmem>>, vector<1x128xf32>
    %13 = vector.broadcast %12 : vector<1x128xf32> to vector<2x128xf32>
    %14 = arith.addf %11, %13 : vector<2x128xf32>
    %cst_11 = arith.constant 0.000000e+00 : f32
    %15 = vector.broadcast %cst_11 : f32 to vector<2x128xf32>
    %16 = arith.maximumf %14, %15 : vector<2x128xf32>
    %17 = arith.truncf %16 : vector<2x128xf32> to vector<2x128xbf16>
    %c0_12 = arith.constant 0 : index
    %c0_13 = arith.constant 0 : index
    %18 = vector.load %arg6[%c0_12, %c0_13] : memref<128x128xbf16, #tpu.memory_space<vmem>>, vector<128x128xbf16>
    %cst_14 = arith.constant dense<0.000000e+00> : vector<2x128xf32>
    %19 = tpu.matmul %17, %18, %cst_14 {dimension_numbers = #tpu.dot_dimension_numbers<[1], [0], [0], [1], [0, 0, 1, 1], [], []>} : vector<2x128xbf16>, vector<128x128xbf16>, vector<2x128xf32> -> vector<2x128xf32>
    %c0_15 = arith.constant 0 : index
    %c0_16 = arith.constant 0 : index
    %20 = vector.load %arg7[%c0_15, %c0_16] : memref<1x128xf32, #tpu.memory_space<vmem>>, vector<1x128xf32>
    %21 = vector.broadcast %20 : vector<1x128xf32> to vector<2x128xf32>
    %22 = arith.addf %19, %21 : vector<2x128xf32>
    %c0_17 = arith.constant 0 : index
    %c0_18 = arith.constant 0 : index
    %23 = vector.load %arg8[%c0_17, %c0_18] : memref<2x128xf32, #tpu.memory_space<vmem>>, vector<2x128xf32>
    tpu.vector_store %arg8[%c0_17, %c0_18], %22 {strides = array<i32>} : memref<2x128xf32, #tpu.memory_space<vmem>>, vector<2x128xf32>,
    return
  }
  func.func @transform_0(%arg0: i32) -> (i32, i32) {
    %c0_i32 = arith.constant 0 : i32
    %c0_i32_0 = arith.constant 0 : i32
    return %arg0, %c0_i32 : i32, i32
  }
  func.func @transform_1(%arg0: i32) -> (i32, i32) {
    %c0_i32 = arith.constant 0 : i32
    %c0_i32_0 = arith.constant 0 : i32
    %c0_i32_1 = arith.constant 0 : i32
    return %c0_i32, %c0_i32_0 : i32, i32
  }
  func.func @transform_2(%arg0: i32) -> (i32, i32) {
    %c0_i32 = arith.constant 0 : i32
    %c0_i32_0 = arith.constant 0 : i32
    %c0_i32_1 = arith.constant 0 : i32
    return %c0_i32, %c0_i32_0 : i32, i32
  }
  func.func @transform_3(%arg0: i32) -> (i32, i32) {
    %c0_i32 = arith.constant 0 : i32
    %c0_i32_0 = arith.constant 0 : i32
    %c0_i32_1 = arith.constant 0 : i32
    return %c0_i32, %c0_i32_0 : i32, i32
  }
  func.func @transform_4(%arg0: i32) -> (i32, i32) {
    %c0_i32 = arith.constant 0 : i32
    %c0_i32_0 = arith.constant 0 : i32
    %c0_i32_1 = arith.constant 0 : i32
    return %c0_i32, %c0_i32_0 : i32, i32
  }
  func.func @transform_5(%arg0: i32) -> (i32, i32) {
    %c0_i32 = arith.constant 0 : i32
    %c0_i32_0 = arith.constant 0 : i32
    %c0_i32_1 = arith.constant 0 : i32
    return %c0_i32, %c0_i32_0 : i32, i32
  }
  func.func @transform_6(%arg0: i32) -> (i32, i32) {
    %c0_i32 = arith.constant 0 : i32
    %c0_i32_0 = arith.constant 0 : i32
    %c0_i32_1 = arith.constant 0 : i32
    return %c0_i32, %c0_i32_0 : i32, i32
  }
  func.func @transform_7(%arg0: i32) -> (i32, i32) {
    %c0_i32 = arith.constant 0 : i32
    %c0_i32_0 = arith.constant 0 : i32
    return %arg0, %c0_i32 : i32, i32
  }
}

</mosaic_0001>

<bundles_post_ra>
// kernel: dqn_forward.1
= control target key start
LH: loop header
LB: loop body
LE: loop exit
PB: predicated region body
PF: predicated region fallthrough
CT: control target
= control target key end

     0   :  { %12 = vsyncpa [#allocation3], 0  ;;  %s696_s0 = inlined_call_operand.hbm [shape: f32[2,8], index: 0, kind: input, shape index: {}]   ;;  %s697_s1 = inlined_call_operand.hbm [shape: bf16[8,128], index: 1, kind: input, shape index: {}]   ;;  %s698_s2 = inlined_call_operand.vmem [shape: f32[1,128], index: 2, kind: input, shape index: {}]   ;;  %s699_s3 = inlined_call_operand.hbm [shape: bf16[128,128], index: 3, kind: input, shape index: {}]   ;;  %s700_s4 = inlined_call_operand.vmem [shape: f32[1,128], index: 4, kind: input, shape index: {}]   ;;  %s701_s5 = inlined_call_operand.hbm [shape: bf16[128,128], index: 5, kind: input, shape index: {}]   ;;  %s702_s6 = inlined_call_operand.vmem [shape: f32[1,128], index: 6, kind: input, shape index: {}]   ;;  %s703_s7 = inlined_call_operand.hbm [shape: f32[2,128], index: 7, kind: output, shape index: {}]  }
   0x1   :  { %13 = vsyncpa [#allocation6], 0 }
   0x2   :  { %14 = vsyncpa [#allocation9], 0 }
   0x3   :  { %15 = vsyncpa [#allocation4], 0  ;;  %s600_s24 = smov [#allocation5]   ;;  %s601_s26 = smov [#allocation2]  }
   0x4   :  { %s32_s25 = sshll.u32 %s600_s24, 4  ;;  %s22_s27 = sshll.u32 %s601_s26, 4  ;;  %s33_s25 = int_to_ptr.vmem [resolvable:$true] %s32_s25  ;;  %s23_s27 = int_to_ptr.vmem [resolvable:$true] %s22_s27 }
   0x5   :  { %s500_s28 = scalar_lea.vmem %s33_s25, 64  ;;  %p505_p1 = scmp.lt.s32.totalorder %s33_s25, %s33_s25 }
   0x6   :  { %p501_p0 = scmp.ne.s32.totalorder %s33_s25, %s500_s28  ;;  %p506_p2 = scmp.lt.s32.totalorder %s500_s28, %s500_s28 }
   0x8   :  { %p507_p3 = por %p506_p2, %p505_p1 }
   0xa   :  { %p508_p4 = pnand %p507_p3, %p501_p0 }
   0xc   :  { %511 = shalt.err (!%p508_p4)
}
   0xd   :  { %35 = dma.hbm_to_vmem [thread:$0]  %s697_s1, 64, %s33_s25, [#allocation6]  }
   0xe   :  { %s520_s8 = scalar_lea.vmem %s23_s27, 32  ;;  %p525_p6 = scmp.lt.s32.totalorder %s23_s27, %s23_s27 }
   0xf   :  { %p521_p5 = scmp.ne.s32.totalorder %s23_s27, %s520_s8  ;;  %p526_p7 = scmp.lt.s32.totalorder %s520_s8, %s520_s8 }
  0x11   :  { %p527_p8 = por %p526_p7, %p525_p6 }
  0x13   :  { %p528_p9 = pnand %p527_p8, %p521_p5 }
  0x15   :  { %531 = shalt.err (!%p528_p9)
}
  0x16   :  { %25 = dma.hbm_to_vmem [thread:$0]  %s696_s0, 32, %s23_s27, [#allocation3]  }
  0x17   :  { %s602_s11 = smov [#allocation7]  }
  0x18   :  { %s43_s12 = sshll.u32 %s602_s11, 4  ;;  %s44_s12 = int_to_ptr.vmem [resolvable:$true] %s43_s12 }
  0x19   :  { %s540_s13 = scalar_lea.vmem %s44_s12, 1024  ;;  %p545_p11 = scmp.lt.s32.totalorder %s44_s12, %s44_s12 }
  0x1a   :  { %p541_p10 = scmp.ne.s32.totalorder %s44_s12, %s540_s13  ;;  %p546_p12 = scmp.lt.s32.totalorder %s540_s13, %s540_s13 }
  0x1c   :  { %p547_p13 = por %p546_p12, %p545_p11 }
  0x1e   :  { %p548_p0 = pnand %p547_p13, %p541_p10 }
  0x20   :  { %551 = shalt.err (!%p548_p0)
}
  0x21   :  { %s603_s1 = smov 64   ;;  %s604_s14 = smov 4  }
  0x22   :  { %49 = dma.hbm_to_vmem [thread:$0]  %s699_s3, 1024, %s44_s12, [#allocation6], %s603_s1, %s603_s1, %s604_s14  }
  0x23   :  { %s605_s17 = smov [#allocation8]  }
  0x24   :  { %s57_s18 = sshll.u32 %s605_s17, 4  ;;  %s58_s18 = int_to_ptr.vmem [resolvable:$true] %s57_s18 }
  0x25   :  { %s560_s0 = scalar_lea.vmem %s58_s18, 1024  ;;  %p565_p2 = scmp.lt.s32.totalorder %s58_s18, %s58_s18 }
  0x26   :  { %p561_p1 = scmp.ne.s32.totalorder %s58_s18, %s560_s0  ;;  %p566_p3 = scmp.lt.s32.totalorder %s560_s0, %s560_s0 }
  0x28   :  { %p567_p4 = por %p566_p3, %p565_p2 }
  0x2a   :  { %p568_p5 = pnand %p567_p4, %p561_p1 }
  0x2c   :  { %571 = shalt.err (!%p568_p5)
}
  0x2d   :  { %63 = dma.hbm_to_vmem [thread:$0]  %s701_s5, 1024, %s58_s18, [#allocation9], %s603_s1, %s603_s1, %s604_s14  }
  0x2e   :  { %592 = dma.done.wait [#allocation3], 32  }
  0x2f   :  { %593 = vsyncadd [#allocation3], 4294967264 }
  0x30   :  { %594 = dma.done.wait [#allocation6], 1088  }
  0x31   :  { %595 = vsyncadd [#allocation6], 4294966208 }
  0x32   :  { %596 = dma.done.wait [#allocation9], 1024  }
  0x33   :  { %597 = vsyncadd [#allocation9], 4294966272  ;;  %v606_v0 = vmov 0.0   ;;  %vm607_vm0 = vmmov 0   ;;  %vm93_vm1 = vcmask 1043456   ;;  %v476_v5 = vld [vmem:[#allocation7 + $0x38] sm:$0xff]  }
  0x34   :  { %421 = vmatprep.subr.bf16.mxu0 %v606_v0  ;;  %423 = vmatprep.mubr.msk.bf16.mxu0 %vm607_vm0, %v606_v0  ;;  %v81_v1 = vld [vmem:[#allocation5] sm:$0xf]  ;;  %v79_v2 = vld [vmem:[#allocation2] sm:$0x3]  ;;  %vm89_vm2 = vcmask 64512   ;;  %v477_v6 = vld [vmem:[#allocation7 + $0x30] sm:$0xff]  }
  0x35   :  { %427 = vmatprep.subr.bf16.mxu1 %v606_v0  ;;  %443 = vmatprep.mubr.msk.bf16.mxu1 %vm607_vm0, %v606_v0  ;;  %v95_v3 = vsel %vm93_vm1, %v81_v1, 0  ;;  %v80_v4 = vpack.c.bf16 %v79_v2, %v79_v2  ;;  %v478_v7 = vld [vmem:[#allocation7 + $0x28] sm:$0xff]   ;;  %v479_v8 = vld [vmem:[#allocation7 + $0x20] sm:$0xff]   ;;  %v480_v9 = vld [vmem:[#allocation7 + $0x18] sm:$0xff]   ;;  %s608_s24 = smov [#allocation10]  }
  0x36   :  { %422 = vmatpush3.bf16.msra.mxu0 %v95_v3  ;;  %428 = vmatpush3.bf16.msra.mxu1 %v476_v5  ;;  %v481_v10 = vld [vmem:[#allocation7 + $0x10] sm:$0xff]   ;;  %v482_v11 = vld [vmem:[#allocation7 + $0x8] sm:$0xff]   ;;  %v483_v12 = vld [vmem:[#allocation7] sm:$0xff]   ;;  %s370_s25 = sshll.u32 %s608_s24, 4  ;;  %s371_s25 = int_to_ptr.vmem [resolvable:$true] %s370_s25 }
  0x37   :  { %447 = vmatprep.subr.bf16.mxu0 %v606_v0  ;;  %429 = vmatprep.subr.bf16.mxu1 %v606_v0  ;;  %v484_v13 = vld [vmem:[#allocation8 + $0x38] sm:$0xff]   ;;  %v485_v14 = vld [vmem:[#allocation8 + $0x30] sm:$0xff]   ;;  %v486_v15 = vld [vmem:[#allocation8 + $0x28] sm:$0xff]   ;;  %p577_p7 = scmp.lt.s32.totalorder %s371_s25, %s371_s25 }
  0x38   :  { %v487_v16 = vld [vmem:[#allocation8 + $0x20] sm:$0xff]   ;;  %v488_v17 = vld [vmem:[#allocation8 + $0x18] sm:$0xff]   ;;  %v489_v18 = vld [vmem:[#allocation8 + $0x10] sm:$0xff]  }
  0x39   :  { %424 = vmatmul.mubr.msk.bf16.vlgmr.msra.gmra.mxu0 %vm89_vm2, %v80_v4  ;;  %v381_v19 = vld [vmem:[%s698_s2] ss:$0 sm:$0xff]  ;;  %v490_v27 = vld [vmem:[#allocation8 + $0x8] sm:$0xff]   ;;  %v491_v28 = vld [vmem:[#allocation8] sm:$0xff]  }
  0x3a   :  { %463 = vmatprep.mubr.msk.bf16.mxu0 %vm607_vm0, %v606_v0  ;;  %430 = vmatpush3.bf16.msra.mxu1 %v477_v6  ;;  %v383_v29 = vld [vmem:[%s700_s4] ss:$0 sm:$0xff]  ;;  %s572_s4 = scalar_lea.vmem %s371_s25, 32 }
  0x3b   :  { %431 = vmatprep.subr.bf16.mxu1 %v606_v0  ;;  %448 = vmatpush3.bf16.msra.mxu0 %v484_v13  ;;  %v392_v37 = vld [vmem:[%s702_s6] ss:$0 sm:$0xff]  ;;  %p573_p6 = scmp.ne.s32.totalorder %s371_s25, %s572_s4  ;;  %p578_p8 = scmp.lt.s32.totalorder %s572_s4, %s572_s4 }
  0x3c   :  { %449 = vmatprep.subr.bf16.mxu0 %v606_v0 }
  0x3d   :  { %p579_p9 = por %p578_p8, %p577_p7 }
  0x3e   :  { %432 = vmatpush3.bf16.msra.mxu1 %v478_v7 }
  0x3f   :  { %433 = vmatprep.subr.bf16.mxu1 %v606_v0  ;;  %450 = vmatpush3.bf16.msra.mxu0 %v485_v14  ;;  %p580_p10 = pnand %p579_p9, %p573_p6 }
  0x40   :  { %451 = vmatprep.subr.bf16.mxu0 %v606_v0 }
  0x42   :  { %434 = vmatpush3.bf16.msra.mxu1 %v479_v8 }
  0x43   :  { %435 = vmatprep.subr.bf16.mxu1 %v606_v0  ;;  %452 = vmatpush3.bf16.msra.mxu0 %v486_v15 }
  0x44   :  { %453 = vmatprep.subr.bf16.mxu0 %v606_v0 }
  0x46   :  { %436 = vmatpush3.bf16.msra.mxu1 %v480_v9 }
  0x47   :  { %437 = vmatprep.subr.bf16.mxu1 %v606_v0  ;;  %454 = vmatpush3.bf16.msra.mxu0 %v487_v16 }
  0x48   :  { %455 = vmatprep.subr.bf16.mxu0 %v606_v0 }
  0x4a   :  { %438 = vmatpush3.bf16.msra.mxu1 %v481_v10 }
  0x4b   :  { %439 = vmatprep.subr.bf16.mxu1 %v606_v0  ;;  %456 = vmatpush3.bf16.msra.mxu0 %v488_v17 }
  0x4c   :  { %457 = vmatprep.subr.bf16.mxu0 %v606_v0 }
  0x4e   :  { %440 = vmatpush3.bf16.msra.mxu1 %v482_v11 }
  0x4f   :  { %441 = vmatprep.subr.bf16.mxu1 %v606_v0  ;;  %458 = vmatpush3.bf16.msra.mxu0 %v489_v18 }
  0x50   :  { %459 = vmatprep.subr.bf16.mxu0 %v606_v0 }
  0x52   :  { %442 = vmatpush3.bf16.msra.mxu1 %v483_v12 }
  0x53   :  { %460 = vmatpush3.bf16.msra.mxu0 %v490_v27 }
  0x54   :  { %461 = vmatprep.subr.bf16.mxu0 %v606_v0 }
  0x57   :  { %462 = vmatpush3.bf16.msra.mxu0 %v491_v28 }
  0xf9   :  { %v131_v20 = vpop.f32.mrf.mxu0 }
  0xfa   :  { %v132_v21 = vadd.f32 %v381_v19, %v131_v20 }
  0xfb   :  { %v425_v22 = vpop.f32.mrf.mxu0 }
  0xfc   :  { %v137_v23 = vmax.f32 %v132_v21, 0.0 }
  0xfd   :  { %v134_v24 = vpop.f32.mrf.mxu0 }
  0xfe   :  { %v138_v25 = vpack.c.bf16 %v137_v23, %v137_v23 }
  0xff   :  { %v426_v26 = vpop.f32.mrf.mxu0 }
 0x100   :  { %444 = vmatmul.mubr.bf16.vlgmr.msra.gmra.mxu1 %v138_v25 }
 0x1c0   :  { %v244_v30 = vpop.f32.mrf.mxu1 }
 0x1c1   :  { %v245_v31 = vadd.f32 %v383_v29, %v244_v30 }
 0x1c2   :  { %v445_v32 = vpop.f32.mrf.mxu1 }
 0x1c3   :  { %v250_v33 = vmax.f32 %v245_v31, 0.0 }
 0x1c4   :  { %v247_v34 = vpop.f32.mrf.mxu1 }
 0x1c5   :  { %v251_v35 = vpack.c.bf16 %v250_v33, %v250_v33 }
 0x1c6   :  { %v446_v36 = vpop.f32.mrf.mxu1 }
 0x1c7   :  { %464 = vmatmul.mubr.bf16.vlgmr.msra.gmra.mxu0 %v251_v35 }
 0x287   :  { %v357_v38 = vpop.f32.mrf.mxu0 }
 0x288   :  { %v358_v39 = vadd.f32 %v392_v37, %v357_v38 }
 0x289   :  { %v465_v40 = vpop.f32.mrf.mxu0 }
 0x28a   :  { %363 = vst [vmem:[#allocation10] sm:$0x3] %v358_v39 }
 0x28b   :  { %v360_v41 = vpop.f32.mrf.mxu0 }
 0x28c   :  { %583 = shalt.err (!%p580_p10)
}
 0x28d   :  { %373 = dma.vmem_to_hbm [thread:$0]  %s371_s25, 32, %s703_s7, [#allocation4]   ;;  %v466_v42 = vpop.f32.mrf.mxu0 }
 0x28e   :  { %598 = dma.done.wait [#allocation4], 32  }
 0x28f   :  { %599 = vsyncadd [#allocation4], 4294967264 }
 0x290   :  { %377 = vsyncpa [#allocation3], 1 }
 0x291   :  { %378 = vsyncpa [#allocation6], 1 }
 0x292   :  { %379 = vsyncpa [#allocation9], 1 }
 0x293   :  { %380 = vsyncpa [#allocation4], 1 }

</bundles_post_ra>
